<compile_context>
chip_gen: v5e
topology: v5e:2x2
jax: 0.10.0
libtpu: 0.0.40
codegen_flags: <defaults>
</compile_context>

<pallas_src>
import jax
import jax.numpy as jnp
from jax.experimental import pallas as pl
from jax.experimental.pallas import tpu as pltpu

LANE = 128          # lane-padded width (widest layer = 128 hidden units)
N_LAYERS = 5


def dqn_kernel(x_ref, w_ref, b_ref, o_ref):
    """x_ref: (B, 128) f32   state, zero-padded past state_dim
       w_ref: (640, 128) bf16 packed weights, layer k = rows [128k, 128k+128)
       b_ref: (8, 128)  f32   packed biases, row k = layer-k bias (zero-padded)
       o_ref: (B, 128)  f32   lane-padded Q-values (cols >= action_dim are 0)
    """
    h = x_ref[...]                                     # f32 activations
    for k in range(N_LAYERS):
        w_k = w_ref[k * LANE:(k + 1) * LANE, :]        # static 128x128 bf16 view
        acc = jnp.dot(h.astype(jnp.bfloat16), w_k,
                      preferred_element_type=jnp.float32)   # f32 accumulation
        acc = acc + b_ref[k:k + 1, :]                  # f32 bias add
        h = jnp.maximum(acc, 0.0) if k < N_LAYERS - 1 else acc   # f32 ReLU
    o_ref[...] = h


def pack_params(params):
    """Pack [(W_t (in,out) f32, b (out,) f32)] into one weight slab + one bias slab.

    Each weight block is zero-padded to (128, 128); each bias row to (128,).
    Zero padding keeps the unused activation lanes exactly zero layer-to-layer.
    """
    w_blocks, b_rows = [], []
    for w, b in params:
        fan_in, fan_out = w.shape
        w_blocks.append(
            jnp.zeros((LANE, LANE), jnp.float32).at[:fan_in, :fan_out].set(w))
        b_rows.append(jnp.zeros((LANE,), jnp.float32).at[:fan_out].set(b))
    while len(b_rows) < 8:                      # pad bias slab sublanes to 8
        b_rows.append(jnp.zeros((LANE,), jnp.float32))
    w_slab = jnp.concatenate(w_blocks, axis=0).astype(jnp.bfloat16)  # (640,128)
    b_slab = jnp.stack(b_rows, axis=0)                               # (8,128) f32
    return w_slab, b_slab


def dqn_forward(x, w_slab, b_slab, action_dim):
    batch, state_dim = x.shape
    # Lane-dense input: zero-pad state features out to 128 lanes (layout only).
    x_pad = jnp.zeros((batch, LANE), jnp.float32).at[:, :state_dim].set(
        x.astype(jnp.float32))
    vmem = pltpu.MemorySpace.VMEM
    out = pl.pallas_call(
        dqn_kernel,
        out_shape=jax.ShapeDtypeStruct((batch, LANE), jnp.float32),
        in_specs=[pl.BlockSpec(memory_space=vmem),
                  pl.BlockSpec(memory_space=vmem),
                  pl.BlockSpec(memory_space=vmem)],
        out_specs=pl.BlockSpec(memory_space=vmem),
    )(x_pad, w_slab, b_slab)
    return out[:, :action_dim]


def init_params(key, state_dim, action_dim):
    """PyTorch-default Linear init: uniform(+/- 1/sqrt(fan_in)).
    Weights stored pre-transposed as (in, out) == PyTorch weight.T."""
    dims = [state_dim, 64, 128, 64, 32, action_dim]
    params = []
    for i in range(len(dims) - 1):
        fan_in, fan_out = dims[i], dims[i + 1]
        key, kw, kb = jax.random.split(key, 3)
        bound = 1.0 / jnp.sqrt(fan_in)
        w_t = jax.random.uniform(kw, (fan_in, fan_out), jnp.float32,
                                 minval=-bound, maxval=bound)
        b = jax.random.uniform(kb, (fan_out,), jnp.float32,
                               minval=-bound, maxval=bound)
        params.append((w_t, b))
    return params


def reference_forward(x, w_slab, b_slab, action_dim):
    """Pure-JAX reference mirroring the kernel's precision (bf16 dot, f32 acc)."""
    batch, state_dim = x.shape
    h = jnp.zeros((batch, LANE), jnp.float32).at[:, :state_dim].set(x)
    for k in range(N_LAYERS):
        w_k = w_slab[k * LANE:(k + 1) * LANE, :]
        acc = jnp.dot(h.astype(jnp.bfloat16), w_k,
                      preferred_element_type=jnp.float32) + b_slab[k]
        h = jnp.maximum(acc, 0.0) if k < N_LAYERS - 1 else acc
    return h[:, :action_dim]


if __name__ == "__main__":
    batch = 8
    state_dim = 16
    action_dim = 4

    key = jax.random.PRNGKey(0)
    key, kx = jax.random.split(key)
    x = jax.random.normal(kx, (batch, state_dim), jnp.float32)

    params = init_params(key, state_dim, action_dim)
    w_slab, b_slab = pack_params(params)

    out = dqn_forward(x, w_slab, b_slab, action_dim)
    out = jax.block_until_ready(out)

    ref = reference_forward(x, w_slab, b_slab, action_dim)
    assert out.shape == (batch, action_dim), out.shape
    assert jnp.allclose(out, ref, atol=2e-3, rtol=2e-3), (
        float(jnp.max(jnp.abs(out - ref))))

    print("KERNEL_OK")
</pallas_src>

<mosaic_0001>
module attributes {stable_mosaic.version = 11 : i64} {
  func.func @dqn_kernel(%arg0: memref<8x128xf32, #tpu.memory_space<vmem>>, %arg1: memref<640x128xbf16, #tpu.memory_space<vmem>>, %arg2: memref<8x128xf32, #tpu.memory_space<vmem>>, %arg3: memref<8x128xf32, #tpu.memory_space<vmem>>) attributes {dimension_semantics = [], scalar_prefetch = 0 : i64, scratch_operands = 0 : i64, tpu.core_type = #tpu.core_type<tc>} {
    %c0 = arith.constant 0 : index
    %c0_0 = arith.constant 0 : index
    %0 = vector.load %arg0[%c0, %c0_0] : memref<8x128xf32, #tpu.memory_space<vmem>>, vector<8x128xf32>
    %c0_1 = arith.constant 0 : index
    %c0_2 = arith.constant 0 : index
    %1 = vector.load %arg1[%c0_1, %c0_2] : memref<640x128xbf16, #tpu.memory_space<vmem>>, vector<128x128xbf16>
    %2 = arith.truncf %0 : vector<8x128xf32> to vector<8x128xbf16>
    %cst = arith.constant dense<0.000000e+00> : vector<8x128xf32>
    %3 = tpu.matmul %2, %1, %cst {dimension_numbers = #tpu.dot_dimension_numbers<[1], [0], [0], [1], [0, 0, 1, 1], [], []>} : vector<8x128xbf16>, vector<128x128xbf16>, vector<8x128xf32> -> vector<8x128xf32>
    %c0_3 = arith.constant 0 : index
    %c0_4 = arith.constant 0 : index
    %4 = vector.load %arg2[%c0_3, %c0_4] : memref<8x128xf32, #tpu.memory_space<vmem>>, vector<1x128xf32>
    %5 = vector.broadcast %4 : vector<1x128xf32> to vector<8x128xf32>
    %6 = arith.addf %3, %5 : vector<8x128xf32>
    %cst_5 = arith.constant 0.000000e+00 : f32
    %7 = vector.broadcast %cst_5 : f32 to vector<8x128xf32>
    %8 = arith.maximumf %6, %7 : vector<8x128xf32>
    %c128 = arith.constant 128 : index
    %c0_6 = arith.constant 0 : index
    %9 = vector.load %arg1[%c128, %c0_6] : memref<640x128xbf16, #tpu.memory_space<vmem>>, vector<128x128xbf16>
    %10 = arith.truncf %8 : vector<8x128xf32> to vector<8x128xbf16>
    %cst_7 = arith.constant dense<0.000000e+00> : vector<8x128xf32>
    %11 = tpu.matmul %10, %9, %cst_7 {dimension_numbers = #tpu.dot_dimension_numbers<[1], [0], [0], [1], [0, 0, 1, 1], [], []>} : vector<8x128xbf16>, vector<128x128xbf16>, vector<8x128xf32> -> vector<8x128xf32>
    %c1 = arith.constant 1 : index
    %c0_8 = arith.constant 0 : index
    %12 = vector.load %arg2[%c1, %c0_8] : memref<8x128xf32, #tpu.memory_space<vmem>>, vector<1x128xf32>
    %13 = vector.broadcast %12 : vector<1x128xf32> to vector<8x128xf32>
    %14 = arith.addf %11, %13 : vector<8x128xf32>
    %cst_9 = arith.constant 0.000000e+00 : f32
    %15 = vector.broadcast %cst_9 : f32 to vector<8x128xf32>
    %16 = arith.maximumf %14, %15 : vector<8x128xf32>
    %c256 = arith.constant 256 : index
    %c0_10 = arith.constant 0 : index
    %17 = vector.load %arg1[%c256, %c0_10] : memref<640x128xbf16, #tpu.memory_space<vmem>>, vector<128x128xbf16>
    %18 = arith.truncf %16 : vector<8x128xf32> to vector<8x128xbf16>
    %cst_11 = arith.constant dense<0.000000e+00> : vector<8x128xf32>
    %19 = tpu.matmul %18, %17, %cst_11 {dimension_numbers = #tpu.dot_dimension_numbers<[1], [0], [0], [1], [0, 0, 1, 1], [], []>} : vector<8x128xbf16>, vector<128x128xbf16>, vector<8x128xf32> -> vector<8x128xf32>
    %c2 = arith.constant 2 : index
    %c0_12 = arith.constant 0 : index
    %20 = vector.load %arg2[%c2, %c0_12] : memref<8x128xf32, #tpu.memory_space<vmem>>, vector<1x128xf32>
    %21 = vector.broadcast %20 : vector<1x128xf32> to vector<8x128xf32>
    %22 = arith.addf %19, %21 : vector<8x128xf32>
    %cst_13 = arith.constant 0.000000e+00 : f32
    %23 = vector.broadcast %cst_13 : f32 to vector<8x128xf32>
    %24 = arith.maximumf %22, %23 : vector<8x128xf32>
    %c384 = arith.constant 384 : index
    %c0_14 = arith.constant 0 : index
    %25 = vector.load %arg1[%c384, %c0_14] : memref<640x128xbf16, #tpu.memory_space<vmem>>, vector<128x128xbf16>
    %26 = arith.truncf %24 : vector<8x128xf32> to vector<8x128xbf16>
    %cst_15 = arith.constant dense<0.000000e+00> : vector<8x128xf32>
    %27 = tpu.matmul %26, %25, %cst_15 {dimension_numbers = #tpu.dot_dimension_numbers<[1], [0], [0], [1], [0, 0, 1, 1], [], []>} : vector<8x128xbf16>, vector<128x128xbf16>, vector<8x128xf32> -> vector<8x128xf32>
    %c3 = arith.constant 3 : index
    %c0_16 = arith.constant 0 : index
    %28 = vector.load %arg2[%c3, %c0_16] : memref<8x128xf32, #tpu.memory_space<vmem>>, vector<1x128xf32>
    %29 = vector.broadcast %28 : vector<1x128xf32> to vector<8x128xf32>
    %30 = arith.addf %27, %29 : vector<8x128xf32>
    %cst_17 = arith.constant 0.000000e+00 : f32
    %31 = vector.broadcast %cst_17 : f32 to vector<8x128xf32>
    %32 = arith.maximumf %30, %31 : vector<8x128xf32>
    %c512 = arith.constant 512 : index
    %c0_18 = arith.constant 0 : index
    %33 = vector.load %arg1[%c512, %c0_18] : memref<640x128xbf16, #tpu.memory_space<vmem>>, vector<128x128xbf16>
    %34 = arith.truncf %32 : vector<8x128xf32> to vector<8x128xbf16>
    %cst_19 = arith.constant dense<0.000000e+00> : vector<8x128xf32>
    %35 = tpu.matmul %34, %33, %cst_19 {dimension_numbers = #tpu.dot_dimension_numbers<[1], [0], [0], [1], [0, 0, 1, 1], [], []>} : vector<8x128xbf16>, vector<128x128xbf16>, vector<8x128xf32> -> vector<8x128xf32>
    %c4 = arith.constant 4 : index
    %c0_20 = arith.constant 0 : index
    %36 = vector.load %arg2[%c4, %c0_20] : memref<8x128xf32, #tpu.memory_space<vmem>>, vector<1x128xf32>
    %37 = vector.broadcast %36 : vector<1x128xf32> to vector<8x128xf32>
    %38 = arith.addf %35, %37 : vector<8x128xf32>
    %c0_21 = arith.constant 0 : index
    %c0_22 = arith.constant 0 : index
    %39 = vector.load %arg3[%c0_21, %c0_22] : memref<8x128xf32, #tpu.memory_space<vmem>>, vector<8x128xf32>
    tpu.vector_store %arg3[%c0_21, %c0_22], %38 {strides = array<i32>} : memref<8x128xf32, #tpu.memory_space<vmem>>, vector<8x128xf32>,
    return
  }
}

</mosaic_0001>

<bundles_post_ra>
// kernel: tpu_custom_call.1
= control target key start
LH: loop header
LB: loop body
LE: loop exit
PB: predicated region body
PF: predicated region fallthrough
CT: control target
= control target key end

     0   :  { %8 = vsyncpa [#allocation3], 0  ;;  %s833_s0 = inlined_call_operand.hbm [shape: f32[8,128], index: 0, kind: input, shape index: {}]   ;;  %s834_s1 = inlined_call_operand.hbm [shape: bf16[640,128], index: 1, kind: input, shape index: {}]   ;;  %s835_s2 = inlined_call_operand.hbm [shape: f32[8,128], index: 2, kind: input, shape index: {}]   ;;  %s836_s3 = inlined_call_operand.hbm [shape: f32[8,128], index: 3, kind: output, shape index: {}]  }
   0x1   :  { %9 = vsyncpa [#allocation6], 0  ;;  %s26_s14 = sshll.u32 %s834_s1, 4  ;;  %s27_s14 = int_to_ptr.hbm [resolvable:$true] %s26_s14 }
   0x2   :  { %10 = vsyncpa [#allocation4], 0  ;;  %s795_s15 = smov [#allocation5]   ;;  %s16_s19 = sshll.u32 %s833_s0, 4  ;;  %s17_s19 = int_to_ptr.hbm [resolvable:$true] %s16_s19 }
   0x3   :  { %s28_s16 = sshll.u32 %s795_s15, 4  ;;  %s796_s20 = smov 64   ;;  %s29_s16 = int_to_ptr.vmem [resolvable:$true] %s28_s16 }
   0x4   :  { %s797_s21 = smov 4   ;;  %s798_s22 = smov [#allocation2]  }
   0x5   :  { %34 = dma.hbm_to_vmem [thread:$0]  %s27_s14, 5120, %s29_s16, [#allocation6], %s796_s20, %s796_s20, %s797_s21  }
   0x6   :  { %s18_s23 = sshll.u32 %s798_s22, 4  ;;  %s40_s26 = sshll.u32 %s835_s2, 4  ;;  %s19_s23 = int_to_ptr.vmem [resolvable:$true] %s18_s23  ;;  %s41_s26 = int_to_ptr.hbm [resolvable:$true] %s40_s26 }
   0x7   :  { %21 = dma.hbm_to_vmem [thread:$0]  %s17_s19, 128, %s19_s23, [#allocation3]  }
   0x8   :  { %s799_s1 = smov [#allocation7]  }
   0x9   :  { %s42_s27 = sshll.u32 %s799_s1, 4  ;;  %s43_s27 = int_to_ptr.vmem [resolvable:$true] %s42_s27 }
   0xa   :  { %45 = dma.hbm_to_vmem [thread:$0]  %s41_s26, 128, %s43_s27, [#allocation6]  }
   0xb   :  { %789 = dma.done.wait [#allocation3], 128  }
   0xc   :  { %790 = vsyncadd [#allocation3], 4294967168 }
   0xd   :  { %791 = dma.done.wait [#allocation6], 5248  }
   0xe   :  { %792 = vsyncadd [#allocation6], 4294962048  ;;  %v649_v0 = vld [vmem:[#allocation5 + $0x38] sm:$0xff]  ;;  %v648_v1 = vld [vmem:[#allocation5 + $0x30] sm:$0xff]  ;;  %s800_s0 = smov [#allocation8]   ;;  %s471_s30 = sshll.u32 %s836_s3, 4  ;;  %s472_s30 = int_to_ptr.hbm [resolvable:$true] %s471_s30 }
   0xf   :  { %126 = vmatpush.bf16.msra.mxu0 %v649_v0  ;;  %v657_v2 = vld [vmem:[#allocation5 + $0x78] sm:$0xff]  ;;  %v647_v3 = vld [vmem:[#allocation5 + $0x28] sm:$0xff]  ;;  %v656_v4 = vld [vmem:[#allocation5 + $0x70] sm:$0xff]  ;;  %s469_s2 = sshll.u32 %s800_s0, 4  ;;  %s470_s2 = int_to_ptr.vmem [resolvable:$true] %s469_s2 }
  0x10   :  { %207 = vmatpush.bf16.msra.mxu1 %v657_v2  ;;  %v655_v5 = vld [vmem:[#allocation5 + $0x68] sm:$0xff]  ;;  %v646_v6 = vld [vmem:[#allocation5 + $0x20] sm:$0xff]  ;;  %v645_v8 = vld [vmem:[#allocation5 + $0x18] sm:$0xff] }
  0x11   :  { %v654_v7 = vld [vmem:[#allocation5 + $0x60] sm:$0xff]  ;;  %v653_v9 = vld [vmem:[#allocation5 + $0x58] sm:$0xff]  ;;  %v644_v10 = vld [vmem:[#allocation5 + $0x10] sm:$0xff] }
  0x12   :  { %v652_v11 = vld [vmem:[#allocation5 + $0x50] sm:$0xff]  ;;  %v643_v12 = vld [vmem:[#allocation5 + $0x8] sm:$0xff]  ;;  %v642_v13 = vld [vmem:[#allocation5] sm:$0xff] }
  0x13   :  { %127 = vmatpush.bf16.msra.mxu0 %v648_v1  ;;  %v58_v14 = vld [vmem:[#allocation2] sm:$0xff]  ;;  %v651_v16 = vld [vmem:[#allocation5 + $0x48] sm:$0xff]  ;;  %v650_v17 = vld [vmem:[#allocation5 + $0x40] sm:$0xff] }
  0x14   :  { %208 = vmatpush.bf16.msra.mxu1 %v656_v4  ;;  %v75_v15 = vpack.c.bf16 %v58_v14, %v58_v14  ;;  %v665_v18 = vld [vmem:[#allocation5 + $0xb8] sm:$0xff]  ;;  %v664_v19 = vld [vmem:[#allocation5 + $0xb0] sm:$0xff]  ;;  %v663_v20 = vld [vmem:[#allocation5 + $0xa8] sm:$0xff] }
  0x15   :  { %288 = vmatpush.bf16.msra.mxu2 %v665_v18  ;;  %v662_v21 = vld [vmem:[#allocation5 + $0xa0] sm:$0xff]  ;;  %v661_v22 = vld [vmem:[#allocation5 + $0x98] sm:$0xff]  ;;  %v660_v23 = vld [vmem:[#allocation5 + $0x90] sm:$0xff] }
  0x16   :  { %v688_v24 = vld [vmem:[#allocation7] ss:$0 sm:$0xff]  ;;  %v659_v30 = vld [vmem:[#allocation5 + $0x88] sm:$0xff]  ;;  %v673_v32 = vld [vmem:[#allocation5 + $0xf8] sm:$0xff] }
  0x17   :  { %128 = vmatpush.bf16.msra.mxu0 %v647_v3  ;;  %v658_v31 = vld [vmem:[#allocation5 + $0x80] sm:$0xff]  ;;  %369 = vmatpush.bf16.msra.mxu3 %v673_v32  ;;  %v672_v33 = vld [vmem:[#allocation5 + $0xf0] sm:$0xff]  ;;  %v671_v34 = vld [vmem:[#allocation5 + $0xe8] sm:$0xff] }
  0x18   :  { %209 = vmatpush.bf16.msra.mxu1 %v655_v5  ;;  %v670_v35 = vld [vmem:[#allocation5 + $0xe0] sm:$0xff]  ;;  %v669_v36 = vld [vmem:[#allocation5 + $0xd8] sm:$0xff]  ;;  %v668_v37 = vld [vmem:[#allocation5 + $0xd0] sm:$0xff] }
  0x19   :  { %289 = vmatpush.bf16.msra.mxu2 %v664_v19  ;;  %v689_v38 = vld [vmem:[#allocation7 + $0x1] ss:$0 sm:$0xff]  ;;  %v667_v44 = vld [vmem:[#allocation5 + $0xc8] sm:$0xff]  ;;  %v681_v46 = vld [vmem:[#allocation5 + $0x138] sm:$0xff] }
  0x1a   :  { %v666_v45 = vld [vmem:[#allocation5 + $0xc0] sm:$0xff]  ;;  %v680_v47 = vld [vmem:[#allocation5 + $0x130] sm:$0xff]  ;;  %v679_v48 = vld [vmem:[#allocation5 + $0x128] sm:$0xff] }
  0x1b   :  { %129 = vmatpush.bf16.msra.mxu0 %v646_v6  ;;  %370 = vmatpush.bf16.msra.mxu3 %v672_v33  ;;  %v678_v49 = vld [vmem:[#allocation5 + $0x120] sm:$0xff]  ;;  %v677_v50 = vld [vmem:[#allocation5 + $0x118] sm:$0xff]  ;;  %v676_v51 = vld [vmem:[#allocation5 + $0x110] sm:$0xff] }
  0x1c   :  { %210 = vmatpush.bf16.msra.mxu1 %v654_v7  ;;  %v690_v52 = vld [vmem:[#allocation7 + $0x2] ss:$0 sm:$0xff]  ;;  %v675_v58 = vld [vmem:[#allocation5 + $0x108] sm:$0xff]  ;;  %v691_v60 = vld [vmem:[#allocation7 + $0x3] ss:$0 sm:$0xff] }
  0x1d   :  { %290 = vmatpush.bf16.msra.mxu2 %v663_v20  ;;  %v674_v59 = vld [vmem:[#allocation5 + $0x100] sm:$0xff] }
  0x1e   :  { %v692_v2 = vld [vmem:[#allocation7 + $0x4] ss:$0 sm:$0xff] }
  0x1f   :  { %130 = vmatpush.bf16.msra.mxu0 %v645_v8  ;;  %371 = vmatpush.bf16.msra.mxu3 %v671_v34 }
  0x20   :  { %211 = vmatpush.bf16.msra.mxu1 %v653_v9 }
  0x21   :  { %291 = vmatpush.bf16.msra.mxu2 %v662_v21 }
  0x23   :  { %131 = vmatpush.bf16.msra.mxu0 %v644_v10  ;;  %372 = vmatpush.bf16.msra.mxu3 %v670_v35 }
  0x24   :  { %212 = vmatpush.bf16.msra.mxu1 %v652_v11 }
  0x25   :  { %292 = vmatpush.bf16.msra.mxu2 %v661_v22 }
  0x27   :  { %132 = vmatpush.bf16.msra.mxu0 %v643_v12  ;;  %373 = vmatpush.bf16.msra.mxu3 %v669_v36 }
  0x28   :  { %213 = vmatpush.bf16.msra.mxu1 %v651_v16 }
  0x29   :  { %293 = vmatpush.bf16.msra.mxu2 %v660_v23 }
  0x2b   :  { %133 = vmatpush.bf16.msra.mxu0 %v642_v13  ;;  %374 = vmatpush.bf16.msra.mxu3 %v668_v37 }
  0x2c   :  { %214 = vmatpush.bf16.msra.mxu1 %v650_v17 }
  0x2d   :  { %294 = vmatpush.bf16.msra.mxu2 %v659_v30 }
  0x2e   :  { %134 = vmatmul.bf16.vlgmr.msra.gmra.mxu0 %v75_v15 }
  0x2f   :  { %375 = vmatpush.bf16.msra.mxu3 %v667_v44  ;;  %450 = vmatpush.bf16.msrb.mxu0 %v681_v46 }
  0x31   :  { %295 = vmatpush.bf16.msra.mxu2 %v658_v31 }
  0x33   :  { %376 = vmatpush.bf16.msra.mxu3 %v666_v45  ;;  %451 = vmatpush.bf16.msrb.mxu0 %v680_v47 }
  0x37   :  { %452 = vmatpush.bf16.msrb.mxu0 %v679_v48 }
  0x3b   :  { %453 = vmatpush.bf16.msrb.mxu0 %v678_v49 }
  0x3f   :  { %454 = vmatpush.bf16.msrb.mxu0 %v677_v50 }
  0x43   :  { %455 = vmatpush.bf16.msrb.mxu0 %v676_v51 }
  0x47   :  { %456 = vmatpush.bf16.msrb.mxu0 %v675_v58 }
  0x4b   :  { %457 = vmatpush.bf16.msrb.mxu0 %v674_v59 }
  0xab   :  { %v135_v25 = vpop.f32.mrf.mxu0 }
  0xac   :  { %v136_v26 = vadd.f32 %v688_v24, %v135_v25 }
  0xae   :  { %v139_v27 = vmax.f32 %v136_v26, 0.0 }
  0xb0   :  { %v156_v28 = vpack.c.bf16 %v139_v27, %v139_v27 }
  0xb2   :  { %215 = vmatmul.bf16.vlgmr.msra.gmra.mxu1 %v156_v28 }
  0xb3   :  { %v137_v29 = vpop.f32.mrf.mxu0 }
 0x12f   :  { %v216_v39 = vpop.f32.mrf.mxu1 }
 0x130   :  { %v217_v40 = vadd.f32 %v689_v38, %v216_v39 }
 0x132   :  { %v220_v41 = vmax.f32 %v217_v40, 0.0 }
 0x134   :  { %v237_v42 = vpack.c.bf16 %v220_v41, %v220_v41 }
 0x136   :  { %296 = vmatmul.bf16.vlgmr.msra.gmra.mxu2 %v237_v42 }
 0x137   :  { %v218_v43 = vpop.f32.mrf.mxu1 }
 0x1b9   :  { %v297_v53 = vpop.f32.mrf.mxu2 }
 0x1ba   :  { %v298_v54 = vadd.f32 %v690_v52, %v297_v53 }
 0x1bc   :  { %v301_v55 = vmax.f32 %v298_v54, 0.0 }
 0x1be   :  { %v318_v56 = vpack.c.bf16 %v301_v55, %v301_v55 }
 0x1c0   :  { %377 = vmatmul.bf16.vlgmr.msra.gmra.mxu3 %v318_v56 }
 0x1c1   :  { %v299_v57 = vpop.f32.mrf.mxu2 }
 0x243   :  { %v378_v61 = vpop.f32.mrf.mxu3 }
 0x244   :  { %v379_v62 = vadd.f32 %v691_v60, %v378_v61 }
 0x246   :  { %v382_v63 = vmax.f32 %v379_v62, 0.0 }
 0x248   :  { %v399_v0 = vpack.c.bf16 %v382_v63, %v382_v63 }
 0x24a   :  { %458 = vmatmul.bf16.vlgmr.msrb.gmra.mxu0 %v399_v0 }
 0x24b   :  { %v380_v1 = vpop.f32.mrf.mxu3 }
 0x2c7   :  { %v459_v3 = vpop.f32.mrf.mxu0 }
 0x2c8   :  { %v460_v4 = vadd.f32 %v692_v2, %v459_v3 }
 0x2ca   :  { %463 = vst [vmem:[#allocation8] sm:$0xff] %v460_v4 }
 0x2cb   :  { %474 = dma.vmem_to_hbm [thread:$0]  %s470_s2, 128, %s472_s30, [#allocation4]  }
 0x2cf   :  { %v461_v5 = vpop.f32.mrf.mxu0 }
 0x2d0   :  { %793 = dma.done.wait [#allocation4], 128  }
 0x2d1   :  { %794 = vsyncadd [#allocation4], 4294967168 }
 0x2d2   :  { %479 = vsyncpa [#allocation3], 1 }
 0x2d3   :  { %480 = vsyncpa [#allocation6], 1 }
 0x2d4   :  { %481 = vsyncpa [#allocation4], 1 }

</bundles_post_ra>
